<compile_context>
chip_gen: v7x
topology: tpu7x:2x2x1
jax: 0.10.0
libtpu: 0.0.40
codegen_flags: <defaults>
</compile_context>

<pallas_src>
import math
import jax
import jax.numpy as jnp
from jax import lax
from jax.experimental import pallas as pl
from jax.experimental.pallas import tpu as pltpu


def _gelu_exact(x):
    # PyTorch nn.GELU() default: exact erf-based GELU (computed in f32).
    return 0.5 * x * (1.0 + lax.erf(x * (1.0 / math.sqrt(2.0))))


def _round_up(a, b):
    return (a + b - 1) // b * b


# ----------------------------------------------------------------------------- kernel
def mlp_kernel(x_ref, w1_ref, b1_ref, w2_ref, b2_ref, o_ref, acc_ref):
    # x_ref : (TM, Dp)   f32   (cast to bf16 in-kernel)
    # w1_ref: (Dp, TH)   bf16  | b1_ref: (1, TH) f32
    # w2_ref: (TH, Dp)   bf16  | b2_ref: (1, Dp) f32
    # o_ref : (TM, Dp)   out dtype
    # acc_ref: (TM, Dp)  f32 VMEM scratch (fc2 accumulator over H-chunks)
    hi = pl.program_id(1)

    @pl.when(hi == 0)
    def _():
        acc_ref[...] = jnp.zeros_like(acc_ref)

    # in-kernel narrowing: f32 HBM read only, cheap VPU cast
    x = x_ref[...].astype(jnp.bfloat16)

    # fc1 on MXU (bf16 in, f32 acc) + f32 bias, exact GELU in f32
    h = jnp.dot(x, w1_ref[...], preferred_element_type=jnp.float32) + b1_ref[...]
    h = _gelu_exact(h)
    # dropout: identity at inference  # TODO(synk): training-mode dropout needs pltpu.prng_* masking
    h = h.astype(jnp.bfloat16)

    # fc2 on MXU, accumulate over H-chunks in f32
    acc_ref[...] += jnp.dot(h, w2_ref[...], preferred_element_type=jnp.float32)

    @pl.when(hi == pl.num_programs(1) - 1)
    def _():
        o_ref[...] = (acc_ref[...] + b2_ref[...]).astype(o_ref.dtype)


# --------------------------------------------------------------------------- planning
def _tpu_budget():
    """(vmem_limit_bytes, num_tensorcores_per_chip) with safe fallbacks."""
    vmem_limit = 48 * 1024 * 1024
    num_tc = 1
    try:
        info = pltpu.get_tpu_info()
        cap = getattr(info, "vmem_capacity_bytes", None)
        if cap:
            vmem_limit = int(cap * 0.80)  # ~104 MiB on v5e/v6e, ~52 MiB on v7x
    except Exception:
        pass
    try:
        kind = jax.devices()[0].device_kind.lower()
        if "v7" in kind:
            num_tc = 2
    except Exception:
        pass
    return vmem_limit, num_tc


def _pick_tile_h(D_pad, H_pad, usable_bytes, requested):
    """Hidden-dim chunk: full residency if it fits, else 128-multiple chunks."""
    if requested is not None:
        tile_h = min(_round_up(requested, 128), H_pad)
    else:
        resident_w = 2 * (2 * D_pad * H_pad) + 4 * (H_pad + D_pad)  # bf16 W1+W2, f32 biases
        if resident_w <= 0.6 * usable_bytes:
            tile_h = H_pad
        else:
            # double-buffered streamed weights must fit ~half of the budget
            tile_h = int((0.5 * usable_bytes) // (8 * D_pad))
            tile_h = max(128, (tile_h // 128) * 128)
            tile_h = min(tile_h, H_pad)
    while H_pad % tile_h:  # chunk must divide H_pad (both are 128-multiples)
        tile_h -= 128
    return max(128, tile_h)


def _pick_tile_m(M, D_pad, tile_h, grid_h, usable_bytes, num_tc, requested):
    wbuf = 1 if grid_h == 1 else 2
    weight_bytes = wbuf * (2 * 2 * D_pad * tile_h + 4 * tile_h) + 4 * D_pad
    remaining = max(usable_bytes - weight_bytes, 4 * 1024 * 1024)
    # per-row VMEM: x f32 (2 bufs) + out (2 bufs) + f32 acc + bf16 x + f32/bf16 h
    per_row = (8 + 8 + 4 + 2) * D_pad + 6 * tile_h
    cap = remaining // per_row

    tile_m = requested if requested is not None else 512
    tile_m = min(tile_m, cap, 1024)
    if tile_m >= 256:
        tile_m = (tile_m // 256) * 256
    elif tile_m >= 128:
        tile_m = 128
    else:
        tile_m = max(8, (tile_m // 8) * 8)

    tile_m = min(tile_m, _round_up(M, 8))  # tiny inputs: one short tile
    # only on 2-TC chips (v7x) is splitting a single big tile worthwhile
    if num_tc >= 2 and M > 512 and _round_up(M, tile_m) // tile_m < 2:
        tile_m = max(256, _round_up(pl.cdiv(M, 2), 256))
    return max(8, tile_m)


# --------------------------------------------------------------------------- wrapper
def prepare_mlp_params(w1, b1, w2, b2):
    """Pad feature dims to 128-multiples and cast once (cache the result)."""
    D, H = w1.shape
    D_pad, H_pad = _round_up(D, 128), _round_up(H, 128)
    return {
        "w1": jnp.pad(w1, ((0, D_pad - D), (0, H_pad - H))).astype(jnp.bfloat16),
        "b1": jnp.pad(b1, (0, H_pad - H)).astype(jnp.float32).reshape(1, H_pad),
        "w2": jnp.pad(w2, ((0, H_pad - H), (0, D_pad - D))).astype(jnp.bfloat16),
        "b2": jnp.pad(b2, (0, D_pad - D)).astype(jnp.float32).reshape(1, D_pad),
        "D": D,
        "H": H,
    }


def mlp_forward(x, params, *, tile_m=None, tile_h=None, out_dtype=None):
    """x: (B, N, D) float32; params from prepare_mlp_params. Returns (B, N, D)."""
    B, N, D = x.shape
    assert D == params["D"], "embed_dim mismatch"
    w1p, b1p, w2p, b2p = params["w1"], params["b1"], params["w2"], params["b2"]
    D_pad, H_pad = w1p.shape
    M = B * N
    out_dtype = out_dtype or x.dtype  # pass jnp.bfloat16 if the consumer takes bf16

    vmem_limit, num_tc = _tpu_budget()
    usable = int(vmem_limit * 0.85)

    tile_h_eff = _pick_tile_h(D_pad, H_pad, usable, tile_h)
    grid_h = H_pad // tile_h_eff
    tile_m_eff = _pick_tile_m(M, D_pad, tile_h_eff, grid_h, usable, num_tc, tile_m)
    M_pad = _round_up(M, tile_m_eff)
    grid_m = M_pad // tile_m_eff

    # pad rows/cols only when actually needed (real ViT dims are already aligned)
    x2d = x.reshape(M, D)
    if M_pad != M or D_pad != D:
        x2d = jnp.pad(x2d, ((0, M_pad - M), (0, D_pad - D)))

    cost = pl.CostEstimate(
        flops=4 * M_pad * D_pad * H_pad,          # two matmuls
        transcendentals=M_pad * H_pad,            # erf in GELU
        bytes_accessed=(M_pad * D_pad * 4         # x (f32 in)
                        + 2 * 2 * D_pad * H_pad   # W1 + W2 (bf16)
                        + 4 * (H_pad + D_pad)     # biases
                        + M_pad * D_pad * jnp.dtype(out_dtype).itemsize),
    )

    def _spec(shape, index_map, mode):
        if mode is None:
            return pl.BlockSpec(shape, index_map)
        return pl.BlockSpec(shape, index_map, pipeline_mode=mode)

    def _call(use_pipeline_modes):
        resident = grid_h == 1
        w_mode = pl.Buffered(1) if (use_pipeline_modes and resident) else None
        b2_mode = pl.Buffered(1) if use_pipeline_modes else None
        return pl.pallas_call(
            mlp_kernel,
            out_shape=jax.ShapeDtypeStruct((M_pad, D_pad), out_dtype),
            grid_spec=pltpu.PrefetchScalarGridSpec(
                num_scalar_prefetch=0,
                grid=(grid_m, grid_h),
                in_specs=[
                    pl.BlockSpec((tile_m_eff, D_pad), lambda i, h: (i, 0)),      # x rows
                    _spec((D_pad, tile_h_eff), lambda i, h: (0, h), w_mode),     # W1 chunk
                    _spec((1, tile_h_eff), lambda i, h: (0, h), w_mode),         # b1 chunk
                    _spec((tile_h_eff, D_pad), lambda i, h: (h, 0), w_mode),     # W2 chunk
                    _spec((1, D_pad), lambda i, h: (0, 0), b2_mode),             # b2
                ],
                out_specs=pl.BlockSpec((tile_m_eff, D_pad), lambda i, h: (i, 0)),
                scratch_shapes=[pltpu.VMEM((tile_m_eff, D_pad), jnp.float32)],
            ),
            compiler_params=pltpu.CompilerParams(
                dimension_semantics=("parallel", "arbitrary"),
                vmem_limit_bytes=vmem_limit,
            ),
            cost_estimate=cost,
        )(x2d, w1p, b1p, w2p, b2p)

    try:
        out = _call(True)
    except Exception:
        # conservative fallback: default double-buffered specs everywhere
        out = _call(False)

    if M_pad != M or D_pad != D:
        out = out[:M, :D]
    return out.reshape(B, N, D)


# ----------------------------------------------------------------------------- demo
def init_params(key, embed_dim, mlp_dim):
    # Deterministic init mimicking nn.Linear defaults (uniform +/- 1/sqrt(fan_in)).
    k1, k2, k3, k4 = jax.random.split(key, 4)
    lim1 = 1.0 / math.sqrt(embed_dim)
    lim2 = 1.0 / math.sqrt(mlp_dim)
    w1 = jax.random.uniform(k1, (embed_dim, mlp_dim), jnp.float32, -lim1, lim1)
    b1 = jax.random.uniform(k2, (mlp_dim,), jnp.float32, -lim1, lim1)
    w2 = jax.random.uniform(k3, (mlp_dim, embed_dim), jnp.float32, -lim2, lim2)
    b2 = jax.random.uniform(k4, (embed_dim,), jnp.float32, -lim2, lim2)
    return w1, b1, w2, b2


def _ref_bf16_matched(x, w1, b1, w2, b2):
    # Same cast points as the kernel -> tight tolerance.
    xb = x.reshape(-1, x.shape[-1]).astype(jnp.bfloat16)
    h = jnp.dot(xb, w1.astype(jnp.bfloat16), preferred_element_type=jnp.float32) + b1
    h = _gelu_exact(h).astype(jnp.bfloat16)
    o = jnp.dot(h, w2.astype(jnp.bfloat16), preferred_element_type=jnp.float32) + b2
    return o.reshape(x.shape)


if __name__ == "__main__":
    # Small ViT-like shapes: batch=2, seq=8, embed_dim=32, mlp_dim=64, dropout (eval -> identity)
    B, N, D, H = 2, 8, 32, 64
    key = jax.random.PRNGKey(0)
    kx, kp = jax.random.split(key)
    x = jax.random.normal(kx, (B, N, D), jnp.float32)
    w1, b1, w2, b2 = init_params(kp, D, H)
    params = prepare_mlp_params(w1, b1, w2, b2)

    out = mlp_forward(x, params)
    jax.block_until_ready(out)

    ref_bf16 = _ref_bf16_matched(x, w1, b1, w2, b2)
    assert jnp.allclose(out, ref_bf16, atol=1e-3, rtol=1e-3), "mismatch vs bf16-matched reference"

    ref_f32 = (_gelu_exact(x.reshape(-1, D) @ w1 + b1) @ w2 + b2).reshape(B, N, D)
    assert jnp.allclose(out, ref_f32, atol=5e-2, rtol=5e-2), "mismatch vs f32 reference"

    # Also exercise the H-chunked (streamed-weight + accumulator) path: H=256, tile_h=128 -> 2 chunks.
    D2, H2 = 32, 256
    k2x, k2p = jax.random.split(jax.random.PRNGKey(1))
    x2 = jax.random.normal(k2x, (B, N, D2), jnp.float32)
    w1b, b1b, w2b, b2b = init_params(k2p, D2, H2)
    params2 = prepare_mlp_params(w1b, b1b, w2b, b2b)
    out2 = mlp_forward(x2, params2, tile_h=128)
    jax.block_until_ready(out2)
    ref2 = _ref_bf16_matched(x2, w1b, b1b, w2b, b2b)
    assert jnp.allclose(out2, ref2, atol=1e-3, rtol=1e-3), "mismatch on H-chunked path"

    print("KERNEL_OK")
</pallas_src>

<mosaic_0001>
module attributes {stable_mosaic.version = 11 : i64} {
  func.func @mlp_kernel(%arg0: i32, %arg1: i32, %arg2: memref<16x128xf32, #tpu.memory_space<vmem>>, %arg3: memref<128x128xbf16, #tpu.memory_space<vmem>>, %arg4: memref<1x128xf32, #tpu.memory_space<vmem>>, %arg5: memref<128x128xbf16, #tpu.memory_space<vmem>>, %arg6: memref<1x128xf32, #tpu.memory_space<vmem>>, %arg7: memref<16x128xf32, #tpu.memory_space<vmem>>, %arg8: memref<16x128xf32, #tpu.memory_space<vmem>>) attributes {dimension_semantics = [#tpu.dimension_semantics<parallel>, #tpu.dimension_semantics<arbitrary>], iteration_bounds = array<i64: 1, 1>, scalar_prefetch = 0 : i64, scratch_operands = 1 : i64, tpu.core_type = #tpu.core_type<tc>, window_params = [{transform_indices = @transform_0, window_bounds = array<i64: 16, 128>}, {pipeline_mode = #tpu.pipeline_mode<synchronous>, transform_indices = @transform_1, window_bounds = array<i64: 128, 128>}, {pipeline_mode = #tpu.pipeline_mode<synchronous>, transform_indices = @transform_2, window_bounds = array<i64: 1, 128>}, {pipeline_mode = #tpu.pipeline_mode<synchronous>, transform_indices = @transform_3, window_bounds = array<i64: 128, 128>}, {pipeline_mode = #tpu.pipeline_mode<synchronous>, transform_indices = @transform_4, window_bounds = array<i64: 1, 128>}, {transform_indices = @transform_5, window_bounds = array<i64: 16, 128>}]} {
    %c0_i32 = arith.constant 0 : i32
    %0 = arith.cmpi eq, %arg1, %c0_i32 : i32
    %1 = arith.extui %0 : i1 to i32
    %c0_i32_0 = arith.constant 0 : i32
    %2 = arith.cmpi ne, %1, %c0_i32_0 : i32
    scf.if %2 {
      %cst_18 = arith.constant 0.000000e+00 : f32
      %27 = vector.broadcast %cst_18 : f32 to vector<16x128xf32>
      %c0_19 = arith.constant 0 : index
      %c0_20 = arith.constant 0 : index
      %28 = vector.load %arg8[%c0_19, %c0_20] : memref<16x128xf32, #tpu.memory_space<vmem>>, vector<16x128xf32>
      tpu.vector_store %arg8[%c0_19, %c0_20], %27 {strides = array<i32>} : memref<16x128xf32, #tpu.memory_space<vmem>>, vector<16x128xf32>,
    } else {
    }
    %c0 = arith.constant 0 : index
    %c0_1 = arith.constant 0 : index
    %3 = vector.load %arg2[%c0, %c0_1] : memref<16x128xf32, #tpu.memory_space<vmem>>, vector<16x128xf32>
    %4 = arith.truncf %3 : vector<16x128xf32> to vector<16x128xbf16>
    %c0_2 = arith.constant 0 : index
    %c0_3 = arith.constant 0 : index
    %5 = vector.load %arg3[%c0_2, %c0_3] : memref<128x128xbf16, #tpu.memory_space<vmem>>, vector<128x128xbf16>
    %cst = arith.constant dense<0.000000e+00> : vector<16x128xf32>
    %6 = tpu.matmul %4, %5, %cst {dimension_numbers = #tpu.dot_dimension_numbers<[1], [0], [0], [1], [0, 0, 1, 1], [], []>} : vector<16x128xbf16>, vector<128x128xbf16>, vector<16x128xf32> -> vector<16x128xf32>
    %c0_4 = arith.constant 0 : index
    %c0_5 = arith.constant 0 : index
    %7 = vector.load %arg4[%c0_4, %c0_5] : memref<1x128xf32, #tpu.memory_space<vmem>>, vector<1x128xf32>
    %8 = vector.broadcast %7 : vector<1x128xf32> to vector<16x128xf32>
    %9 = arith.addf %6, %8 : vector<16x128xf32>
    %cst_6 = arith.constant 5.000000e-01 : f32
    %10 = vector.broadcast %cst_6 : f32 to vector<16x128xf32>
    %11 = arith.mulf %10, %9 : vector<16x128xf32>
    %cst_7 = arith.constant 0.707106769 : f32
    %12 = vector.broadcast %cst_7 : f32 to vector<16x128xf32>
    %13 = arith.mulf %9, %12 : vector<16x128xf32>
    %14 = math.erf %13 : vector<16x128xf32>
    %cst_8 = arith.constant 1.000000e+00 : f32
    %15 = vector.broadcast %cst_8 : f32 to vector<16x128xf32>
    %16 = arith.addf %15, %14 : vector<16x128xf32>
    %17 = arith.mulf %11, %16 : vector<16x128xf32>
    %18 = arith.truncf %17 : vector<16x128xf32> to vector<16x128xbf16>
    %c0_9 = arith.constant 0 : index
    %c0_10 = arith.constant 0 : index
    %19 = vector.load %arg8[%c0_9, %c0_10] : memref<16x128xf32, #tpu.memory_space<vmem>>, vector<16x128xf32>
    %c0_11 = arith.constant 0 : index
    %c0_12 = arith.constant 0 : index
    %20 = vector.load %arg5[%c0_11, %c0_12] : memref<128x128xbf16, #tpu.memory_space<vmem>>, vector<128x128xbf16>
    %cst_13 = arith.constant dense<0.000000e+00> : vector<16x128xf32>
    %21 = tpu.matmul %18, %20, %cst_13 {dimension_numbers = #tpu.dot_dimension_numbers<[1], [0], [0], [1], [0, 0, 1, 1], [], []>} : vector<16x128xbf16>, vector<128x128xbf16>, vector<16x128xf32> -> vector<16x128xf32>
    %22 = arith.addf %19, %21 : vector<16x128xf32>
    %c0_14 = arith.constant 0 : index
    %c0_15 = arith.constant 0 : index
    %23 = vector.load %arg8[%c0_14, %c0_15] : memref<16x128xf32, #tpu.memory_space<vmem>>, vector<16x128xf32>
    tpu.vector_store %arg8[%c0_14, %c0_15], %22 {strides = array<i32>} : memref<16x128xf32, #tpu.memory_space<vmem>>, vector<16x128xf32>,
    %c0_i32_16 = arith.constant 0 : i32
    %24 = arith.cmpi eq, %arg1, %c0_i32_16 : i32
    %25 = arith.extui %24 : i1 to i32
    %c0_i32_17 = arith.constant 0 : i32
    %26 = arith.cmpi ne, %25, %c0_i32_17 : i32
    scf.if %26 {
      %c0_18 = arith.constant 0 : index
      %c0_19 = arith.constant 0 : index
      %27 = vector.load %arg8[%c0_18, %c0_19] : memref<16x128xf32, #tpu.memory_space<vmem>>, vector<16x128xf32>
      %c0_20 = arith.constant 0 : index
      %c0_21 = arith.constant 0 : index
      %28 = vector.load %arg6[%c0_20, %c0_21] : memref<1x128xf32, #tpu.memory_space<vmem>>, vector<1x128xf32>
      %29 = vector.broadcast %28 : vector<1x128xf32> to vector<16x128xf32>
      %30 = arith.addf %27, %29 : vector<16x128xf32>
      %c0_22 = arith.constant 0 : index
      %c0_23 = arith.constant 0 : index
      %31 = vector.load %arg7[%c0_22, %c0_23] : memref<16x128xf32, #tpu.memory_space<vmem>>, vector<16x128xf32>
      tpu.vector_store %arg7[%c0_22, %c0_23], %30 {strides = array<i32>} : memref<16x128xf32, #tpu.memory_space<vmem>>, vector<16x128xf32>,
    } else {
    }
    return
  }
  func.func @transform_0(%arg0: i32, %arg1: i32) -> (i32, i32) {
    %c0_i32 = arith.constant 0 : i32
    %c0_i32_0 = arith.constant 0 : i32
    return %arg0, %c0_i32 : i32, i32
  }
  func.func @transform_1(%arg0: i32, %arg1: i32) -> (i32, i32) {
    %c0_i32 = arith.constant 0 : i32
    %c0_i32_0 = arith.constant 0 : i32
    return %c0_i32, %arg1 : i32, i32
  }
  func.func @transform_2(%arg0: i32, %arg1: i32) -> (i32, i32) {
    %c0_i32 = arith.constant 0 : i32
    %c0_i32_0 = arith.constant 0 : i32
    return %c0_i32, %arg1 : i32, i32
  }
  func.func @transform_3(%arg0: i32, %arg1: i32) -> (i32, i32) {
    %c0_i32 = arith.constant 0 : i32
    %c0_i32_0 = arith.constant 0 : i32
    return %arg1, %c0_i32 : i32, i32
  }
  func.func @transform_4(%arg0: i32, %arg1: i32) -> (i32, i32) {
    %c0_i32 = arith.constant 0 : i32
    %c0_i32_0 = arith.constant 0 : i32
    %c0_i32_1 = arith.constant 0 : i32
    return %c0_i32, %c0_i32_0 : i32, i32
  }
  func.func @transform_5(%arg0: i32, %arg1: i32) -> (i32, i32) {
    %c0_i32 = arith.constant 0 : i32
    %c0_i32_0 = arith.constant 0 : i32
    return %arg0, %c0_i32 : i32, i32
  }
}

module attributes {stable_mosaic.version = 11 : i64} {
  func.func @mlp_kernel(%arg0: i32, %arg1: i32, %arg2: memref<16x128xf32, #tpu.memory_space<vmem>>, %arg3: memref<128x128xbf16, #tpu.memory_space<vmem>>, %arg4: memref<1x128xf32, #tpu.memory_space<vmem>>, %arg5: memref<128x128xbf16, #tpu.memory_space<vmem>>, %arg6: memref<1x128xf32, #tpu.memory_space<vmem>>, %arg7: memref<16x128xf32, #tpu.memory_space<vmem>>, %arg8: memref<16x128xf32, #tpu.memory_space<vmem>>) attributes {dimension_semantics = [#tpu.dimension_semantics<parallel>, #tpu.dimension_semantics<arbitrary>], iteration_bounds = array<i64: 1, 1>, scalar_prefetch = 0 : i64, scratch_operands = 1 : i64, tpu.core_type = #tpu.core_type<tc>, window_params = [{transform_indices = @transform_0, window_bounds = array<i64: 16, 128>}, {transform_indices = @transform_1, window_bounds = array<i64: 128, 128>}, {transform_indices = @transform_2, window_bounds = array<i64: 1, 128>}, {transform_indices = @transform_3, window_bounds = array<i64: 128, 128>}, {pipeline_mode = #tpu.pipeline_mode<synchronous>, transform_indices = @transform_4, window_bounds = array<i64: 1, 128>}, {transform_indices = @transform_5, window_bounds = array<i64: 16, 128>}]} {
    %c0_i32 = arith.constant 0 : i32
    %0 = arith.cmpi eq, %arg1, %c0_i32 : i32
    %1 = arith.extui %0 : i1 to i32
    %c0_i32_0 = arith.constant 0 : i32
    %2 = arith.cmpi ne, %1, %c0_i32_0 : i32
    scf.if %2 {
      %cst_18 = arith.constant 0.000000e+00 : f32
      %27 = vector.broadcast %cst_18 : f32 to vector<16x128xf32>
      %c0_19 = arith.constant 0 : index
      %c0_20 = arith.constant 0 : index
      %28 = vector.load %arg8[%c0_19, %c0_20] : memref<16x128xf32, #tpu.memory_space<vmem>>, vector<16x128xf32>
      tpu.vector_store %arg8[%c0_19, %c0_20], %27 {strides = array<i32>} : memref<16x128xf32, #tpu.memory_space<vmem>>, vector<16x128xf32>,
    } else {
    }
    %c0 = arith.constant 0 : index
    %c0_1 = arith.constant 0 : index
    %3 = vector.load %arg2[%c0, %c0_1] : memref<16x128xf32, #tpu.memory_space<vmem>>, vector<16x128xf32>
    %4 = arith.truncf %3 : vector<16x128xf32> to vector<16x128xbf16>
    %c0_2 = arith.constant 0 : index
    %c0_3 = arith.constant 0 : index
    %5 = vector.load %arg3[%c0_2, %c0_3] : memref<128x128xbf16, #tpu.memory_space<vmem>>, vector<128x128xbf16>
    %cst = arith.constant dense<0.000000e+00> : vector<16x128xf32>
    %6 = tpu.matmul %4, %5, %cst {dimension_numbers = #tpu.dot_dimension_numbers<[1], [0], [0], [1], [0, 0, 1, 1], [], []>} : vector<16x128xbf16>, vector<128x128xbf16>, vector<16x128xf32> -> vector<16x128xf32>
    %c0_4 = arith.constant 0 : index
    %c0_5 = arith.constant 0 : index
    %7 = vector.load %arg4[%c0_4, %c0_5] : memref<1x128xf32, #tpu.memory_space<vmem>>, vector<1x128xf32>
    %8 = vector.broadcast %7 : vector<1x128xf32> to vector<16x128xf32>
    %9 = arith.addf %6, %8 : vector<16x128xf32>
    %cst_6 = arith.constant 5.000000e-01 : f32
    %10 = vector.broadcast %cst_6 : f32 to vector<16x128xf32>
    %11 = arith.mulf %10, %9 : vector<16x128xf32>
    %cst_7 = arith.constant 0.707106769 : f32
    %12 = vector.broadcast %cst_7 : f32 to vector<16x128xf32>
    %13 = arith.mulf %9, %12 : vector<16x128xf32>
    %14 = math.erf %13 : vector<16x128xf32>
    %cst_8 = arith.constant 1.000000e+00 : f32
    %15 = vector.broadcast %cst_8 : f32 to vector<16x128xf32>
    %16 = arith.addf %15, %14 : vector<16x128xf32>
    %17 = arith.mulf %11, %16 : vector<16x128xf32>
    %18 = arith.truncf %17 : vector<16x128xf32> to vector<16x128xbf16>
    %c0_9 = arith.constant 0 : index
    %c0_10 = arith.constant 0 : index
    %19 = vector.load %arg8[%c0_9, %c0_10] : memref<16x128xf32, #tpu.memory_space<vmem>>, vector<16x128xf32>
    %c0_11 = arith.constant 0 : index
    %c0_12 = arith.constant 0 : index
    %20 = vector.load %arg5[%c0_11, %c0_12] : memref<128x128xbf16, #tpu.memory_space<vmem>>, vector<128x128xbf16>
    %cst_13 = arith.constant dense<0.000000e+00> : vector<16x128xf32>
    %21 = tpu.matmul %18, %20, %cst_13 {dimension_numbers = #tpu.dot_dimension_numbers<[1], [0], [0], [1], [0, 0, 1, 1], [], []>} : vector<16x128xbf16>, vector<128x128xbf16>, vector<16x128xf32> -> vector<16x128xf32>
    %22 = arith.addf %19, %21 : vector<16x128xf32>
    %c0_14 = arith.constant 0 : index
    %c0_15 = arith.constant 0 : index
    %23 = vector.load %arg8[%c0_14, %c0_15] : memref<16x128xf32, #tpu.memory_space<vmem>>, vector<16x128xf32>
    tpu.vector_store %arg8[%c0_14, %c0_15], %22 {strides = array<i32>} : memref<16x128xf32, #tpu.memory_space<vmem>>, vector<16x128xf32>,
    %c0_i32_16 = arith.constant 0 : i32
    %24 = arith.cmpi eq, %arg1, %c0_i32_16 : i32
    %25 = arith.extui %24 : i1 to i32
    %c0_i32_17 = arith.constant 0 : i32
    %26 = arith.cmpi ne, %25, %c0_i32_17 : i32
    scf.if %26 {
      %c0_18 = arith.constant 0 : index
      %c0_19 = arith.constant 0 : index
      %27 = vector.load %arg8[%c0_18, %c0_19] : memref<16x128xf32, #tpu.memory_space<vmem>>, vector<16x128xf32>
      %c0_20 = arith.constant 0 : index
      %c0_21 = arith.constant 0 : index
      %28 = vector.load %arg6[%c0_20, %c0_21] : memref<1x128xf32, #tpu.memory_space<vmem>>, vector<1x128xf32>
      %29 = vector.broadcast %28 : vector<1x128xf32> to vector<16x128xf32>
      %30 = arith.addf %27, %29 : vector<16x128xf32>
      %c0_22 = arith.constant 0 : index
      %c0_23 = arith.constant 0 : index
      %31 = vector.load %arg7[%c0_22, %c0_23] : memref<16x128xf32, #tpu.memory_space<vmem>>, vector<16x128xf32>
      tpu.vector_store %arg7[%c0_22, %c0_23], %30 {strides = array<i32>} : memref<16x128xf32, #tpu.memory_space<vmem>>, vector<16x128xf32>,
    } else {
    }
    return
  }
  func.func @transform_0(%arg0: i32, %arg1: i32) -> (i32, i32) {
    %c0_i32 = arith.constant 0 : i32
    %c0_i32_0 = arith.constant 0 : i32
    return %arg0, %c0_i32 : i32, i32
  }
  func.func @transform_1(%arg0: i32, %arg1: i32) -> (i32, i32) {
    %c0_i32 = arith.constant 0 : i32
    %c0_i32_0 = arith.constant 0 : i32
    return %c0_i32, %arg1 : i32, i32
  }
  func.func @transform_2(%arg0: i32, %arg1: i32) -> (i32, i32) {
    %c0_i32 = arith.constant 0 : i32
    %c0_i32_0 = arith.constant 0 : i32
    return %c0_i32, %arg1 : i32, i32
  }
  func.func @transform_3(%arg0: i32, %arg1: i32) -> (i32, i32) {
    %c0_i32 = arith.constant 0 : i32
    %c0_i32_0 = arith.constant 0 : i32
    return %arg1, %c0_i32 : i32, i32
  }
  func.func @transform_4(%arg0: i32, %arg1: i32) -> (i32, i32) {
    %c0_i32 = arith.constant 0 : i32
    %c0_i32_0 = arith.constant 0 : i32
    %c0_i32_1 = arith.constant 0 : i32
    return %c0_i32, %c0_i32_0 : i32, i32
  }
  func.func @transform_5(%arg0: i32, %arg1: i32) -> (i32, i32) {
    %c0_i32 = arith.constant 0 : i32
    %c0_i32_0 = arith.constant 0 : i32
    return %arg0, %c0_i32 : i32, i32
  }
}

</mosaic_0001>

<bundles_post_ra>
// kernel: tpu_custom_call.1
= control target key start
LH: loop header
LB: loop body
LE: loop exit
PB: predicated region body
PF: predicated region fallthrough
CT: control target
= control target key end

     0   :  { %10 = vsyncpa [#allocation4], 0  ;;  %s646_s0 = inlined_call_operand.hbm [shape: f32[16,128], index: 0, kind: input, shape index: {}]   ;;  %s647_s1 = inlined_call_operand.hbm [shape: bf16[128,128], index: 1, kind: input, shape index: {}]   ;;  %s648_s2 = inlined_call_operand.vmem [shape: f32[1,128], index: 2, kind: input, shape index: {}]   ;;  %s649_s3 = inlined_call_operand.hbm [shape: bf16[128,128], index: 3, kind: input, shape index: {}]   ;;  %s650_s4 = inlined_call_operand.vmem [shape: f32[1,128], index: 4, kind: input, shape index: {}]   ;;  %s651_s5 = inlined_call_operand.hbm [shape: f32[16,128], index: 5, kind: output, shape index: {}]  }
   0x1   :  { %11 = vsyncpa [#allocation7], 0 }
   0x2   :  { %12 = vsyncpa [#allocation5], 0  ;;  %s540_s18 = smov [#allocation6]   ;;  %s446_s22 = scalar_lea.hbm %s647_s1, 1024 }
   0x3   :  { %s30_s19 = sshll.u32 %s540_s18, 4  ;;  %p447_p0 = scmp.ne.s32.totalorder %s647_s1, %s446_s22  ;;  %s31_s19 = int_to_ptr.vmem [resolvable:$true] %s30_s19 }
   0x4   :  { %p450_p1 = scmp.lt.u32.totalorder %s446_s22, %s647_s1 }
   0x6   :  { %p452_p2 = pnand %p450_p1, %p447_p0 }
   0x8   :  { %455 = shalt.err (!%p452_p2)
}
   0x9   :  { %s456_s27 = scalar_lea.vmem %s31_s19, 1024  ;;  %p461_p4 = scmp.lt.s32.totalorder %s31_s19, %s31_s19 }
   0xa   :  { %p457_p3 = scmp.ne.s32.totalorder %s31_s19, %s456_s27  ;;  %p462_p5 = scmp.lt.s32.totalorder %s456_s27, %s456_s27 }
   0xc   :  { %p463_p6 = por %p462_p5, %p461_p4 }
   0xe   :  { %p464_p7 = pnand %p463_p6, %p457_p3 }
  0x10   :  { %467 = shalt.err (!%p464_p7)
}
  0x11   :  { %s541_s28 = smov 64   ;;  %s542_s29 = smov 4  }
  0x12   :  { %36 = dma.hbm_to_vmem [thread:$0]  %s647_s1, 1024, %s31_s19, [#allocation7], %s541_s28, %s541_s28, %s542_s29  }
  0x13   :  { %s543_s7 = smov [#allocation3]   ;;  %s468_s11 = scalar_lea.hbm %s646_s0, 256 }
  0x14   :  { %s18_s8 = sshll.u32 %s543_s7, 4  ;;  %p469_p8 = scmp.ne.s32.totalorder %s646_s0, %s468_s11  ;;  %s19_s8 = int_to_ptr.vmem [resolvable:$true] %s18_s8 }
  0x15   :  { %p472_p9 = scmp.lt.u32.totalorder %s468_s11, %s646_s0 }
  0x17   :  { %p474_p10 = pnand %p472_p9, %p469_p8 }
  0x19   :  { %477 = shalt.err (!%p474_p10)
}
  0x1a   :  { %s478_s16 = scalar_lea.vmem %s19_s8, 256  ;;  %p483_p12 = scmp.lt.s32.totalorder %s19_s8, %s19_s8 }
  0x1b   :  { %p479_p11 = scmp.ne.s32.totalorder %s19_s8, %s478_s16  ;;  %p484_p13 = scmp.lt.s32.totalorder %s478_s16, %s478_s16 }
  0x1d   :  { %p485_p0 = por %p484_p13, %p483_p12 }
  0x1f   :  { %p486_p1 = pnand %p485_p0, %p479_p11 }
  0x21   :  { %489 = shalt.err (!%p486_p1)
}
  0x22   :  { %s544_s1 = smov 128   ;;  %s545_s17 = smov 8  }
  0x23   :  { %24 = dma.hbm_to_vmem [thread:$0]  %s646_s0, 256, %s19_s8, [#allocation4], %s544_s1, %s544_s1, %s545_s17  }
  0x24   :  { %s546_s20 = smov [#allocation8]   ;;  %s490_s24 = scalar_lea.hbm %s649_s3, 1024 }
  0x25   :  { %s44_s21 = sshll.u32 %s546_s20, 4  ;;  %p491_p2 = scmp.ne.s32.totalorder %s649_s3, %s490_s24  ;;  %s45_s21 = int_to_ptr.vmem [resolvable:$true] %s44_s21 }
  0x26   :  { %p494_p3 = scmp.lt.u32.totalorder %s490_s24, %s649_s3 }
  0x28   :  { %p496_p4 = pnand %p494_p3, %p491_p2 }
  0x2a   :  { %499 = shalt.err (!%p496_p4)
}
  0x2b   :  { %s500_s6 = scalar_lea.vmem %s45_s21, 1024  ;;  %p505_p6 = scmp.lt.s32.totalorder %s45_s21, %s45_s21 }
  0x2c   :  { %p501_p5 = scmp.ne.s32.totalorder %s45_s21, %s500_s6  ;;  %p506_p7 = scmp.lt.s32.totalorder %s500_s6, %s500_s6 }
  0x2e   :  { %p507_p8 = por %p506_p7, %p505_p6 }
  0x30   :  { %p508_p9 = pnand %p507_p8, %p501_p5 }
  0x32   :  { %511 = shalt.err (!%p508_p9)
}
  0x33   :  { %50 = dma.hbm_to_vmem [thread:$0]  %s649_s3, 1024, %s45_s21, [#allocation7], %s541_s28, %s541_s28, %s542_s29  }
  0x34   :  { %534 = dma.done.wait [#allocation4], 256  }
  0x35   :  { %535 = vsyncadd [#allocation4], 4294967040 }
  0x36   :  { %536 = dma.done.wait [#allocation7], 2048  }
  0x37   :  { %537 = vsyncadd [#allocation7], 4294965248  ;;  %v547_v0 = vmov 0.0   ;;  %vm548_vm0 = vmmov 0   ;;  %v426_v1 = vld [vmem:[#allocation6] sm:$0xff]   ;;  %v427_v2 = vld [vmem:[#allocation6 + $0x8] sm:$0xff]  }
  0x38   :  { %376 = vmatprep.subr.bf16.mxu0 %v547_v0  ;;  %392 = vmatprep.mubr.msk.bf16.mxu0 %vm548_vm0, %v547_v0  ;;  %v428_v3 = vld [vmem:[#allocation6 + $0x10] sm:$0xff]   ;;  %v434_v4 = vld [vmem:[#allocation8] sm:$0xff]   ;;  %v429_v5 = vld [vmem:[#allocation6 + $0x18] sm:$0xff]   ;;  %s549_s8 = smov [#allocation9]  }
  0x39   :  { %396 = vmatprep.subr.bf16.mxu1 %v547_v0  ;;  %412 = vmatprep.mubr.msk.bf16.mxu1 %vm548_vm0, %v547_v0  ;;  %v435_v6 = vld [vmem:[#allocation8 + $0x8] sm:$0xff]   ;;  %v430_v7 = vld [vmem:[#allocation6 + $0x20] sm:$0xff]   ;;  %v432_v9 = vld [vmem:[#allocation6 + $0x30] sm:$0xff]   ;;  %s327_s9 = sshll.u32 %s549_s8, 4  ;;  %s328_s9 = int_to_ptr.vmem [resolvable:$true] %s327_s9 }
  0x3a   :  { %377 = vmatpush3.bf16.msra.mxu0 %v426_v1  ;;  %397 = vmatpush3.bf16.msra.mxu1 %v434_v4  ;;  %v431_v8 = vld [vmem:[#allocation6 + $0x28] sm:$0xff]   ;;  %v433_v10 = vld [vmem:[#allocation6 + $0x38] sm:$0xff]   ;;  %v69_v11 = vld [vmem:[#allocation3] sm:$0xff]  ;;  %s512_s10 = scalar_lea.vmem %s328_s9, 256  ;;  %p517_p11 = scmp.lt.s32.totalorder %s328_s9, %s328_s9 }
  0x3b   :  { %378 = vmatprep.subr.bf16.mxu0 %v547_v0  ;;  %398 = vmatprep.subr.bf16.mxu1 %v547_v0  ;;  %v70_v12 = vld [vmem:[#allocation3 + $0x8] sm:$0xff]  ;;  %v436_v14 = vld [vmem:[#allocation8 + $0x10] sm:$0xff]   ;;  %v438_v16 = vld [vmem:[#allocation8 + $0x20] sm:$0xff]   ;;  %p513_p10 = scmp.ne.s32.totalorder %s328_s9, %s512_s10  ;;  %p518_p12 = scmp.lt.s32.totalorder %s512_s10, %s512_s10 }
  0x3c   :  { %v71_v13 = vpack.c.bf16 %v70_v12, %v69_v11  ;;  %v437_v15 = vld [vmem:[#allocation8 + $0x18] sm:$0xff]   ;;  %v439_v17 = vld [vmem:[#allocation8 + $0x28] sm:$0xff]   ;;  %v440_v18 = vld [vmem:[#allocation8 + $0x30] sm:$0xff]  }
  0x3d   :  { %v441_v19 = vld [vmem:[#allocation8 + $0x38] sm:$0xff]   ;;  %v340_v20 = vld [vmem:[%s648_s2] ss:$0 sm:$0xff]  ;;  %p519_p13 = por %p518_p12, %p517_p11 }
  0x3e   :  { %379 = vmatpush3.bf16.msra.mxu0 %v427_v2  ;;  %399 = vmatpush3.bf16.msra.mxu1 %v435_v6  ;;  %v357_v38 = vld [vmem:[%s650_s4] ss:$0 sm:$0xff] }
  0x3f   :  { %380 = vmatprep.subr.bf16.mxu0 %v547_v0  ;;  %400 = vmatprep.subr.bf16.mxu1 %v547_v0  ;;  %p520_p0 = pnand %p519_p13, %p513_p10 }
  0x42   :  { %381 = vmatpush3.bf16.msra.mxu0 %v428_v3  ;;  %401 = vmatpush3.bf16.msra.mxu1 %v436_v14 }
  0x43   :  { %382 = vmatprep.subr.bf16.mxu0 %v547_v0  ;;  %402 = vmatprep.subr.bf16.mxu1 %v547_v0 }
  0x46   :  { %383 = vmatpush3.bf16.msra.mxu0 %v429_v5  ;;  %403 = vmatpush3.bf16.msra.mxu1 %v437_v15 }
  0x47   :  { %384 = vmatprep.subr.bf16.mxu0 %v547_v0  ;;  %404 = vmatprep.subr.bf16.mxu1 %v547_v0 }
  0x4a   :  { %385 = vmatpush3.bf16.msra.mxu0 %v430_v7  ;;  %405 = vmatpush3.bf16.msra.mxu1 %v438_v16 }
  0x4b   :  { %386 = vmatprep.subr.bf16.mxu0 %v547_v0  ;;  %406 = vmatprep.subr.bf16.mxu1 %v547_v0 }
  0x4e   :  { %387 = vmatpush3.bf16.msra.mxu0 %v431_v8  ;;  %407 = vmatpush3.bf16.msra.mxu1 %v439_v17 }
  0x4f   :  { %388 = vmatprep.subr.bf16.mxu0 %v547_v0  ;;  %408 = vmatprep.subr.bf16.mxu1 %v547_v0 }
  0x52   :  { %389 = vmatpush3.bf16.msra.mxu0 %v432_v9  ;;  %409 = vmatpush3.bf16.msra.mxu1 %v440_v18 }
  0x53   :  { %390 = vmatprep.subr.bf16.mxu0 %v547_v0  ;;  %410 = vmatprep.subr.bf16.mxu1 %v547_v0 }
  0x56   :  { %391 = vmatpush3.bf16.msra.mxu0 %v433_v10  ;;  %411 = vmatpush3.bf16.msra.mxu1 %v441_v19 }
  0x59   :  { %393 = vmatmul.mubr.bf16.vlgmr.msra.gmra.mrb[0].mxu0 %v71_v13 }
 0x12c   :  { %v177_v21 = vpop.f32.mrb[0].mxu0 }
 0x12d   :  { %v178_v22 = vadd.f32 %v340_v20, %v177_v21  ;;  %v394_v23 = vpop.f32.mrb[1].mxu0 }
 0x12e   :  { %v180_v24 = vpop.f32.mrb[2].mxu0 }
 0x12f   :  { %v186_v25 = vmul.f32 0.70710677, %v178_v22  ;;  %v181_v26 = vadd.f32 %v340_v20, %v180_v24  ;;  %v395_v27 = vpop.f32.mrb[3].mxu0  ;;  %v184_v32 = vmul.f32 0.5, %v178_v22 }
 0x131   :  { %442 = verf.f32 %v186_v25  ;;  %v187_v28 = vmul.f32 0.70710677, %v181_v26  ;;  %v185_v33 = vmul.f32 0.5, %v181_v26 }
 0x133   :  { %444 = verf.f32 %v187_v28 }
 0x13b   :  { %v443_v29 = vpop.eup %442 }
 0x13c   :  { %v190_v30 = vadd.f32 1.0, %v443_v29 }
 0x13d   :  { %v445_v31 = vpop.eup %444 }
 0x13e   :  { %v191_v34 = vadd.f32 1.0, %v445_v31  ;;  %v192_v35 = vmul.f32 %v190_v30, %v184_v32 }
 0x140   :  { %v193_v36 = vmul.f32 %v191_v34, %v185_v33 }
 0x142   :  { %v194_v37 = vpack.c.bf16 %v193_v36, %v192_v35 }
 0x144   :  { %413 = vmatmul.mubr.bf16.vlgmr.msra.gmra.mrb[0].mxu1 %v194_v37 }
 0x217   :  { %v295_v39 = vpop.f32.mrb[0].mxu1 }
 0x218   :  { %v318_v40 = vadd.f32 %v357_v38, %v295_v39  ;;  %v414_v41 = vpop.f32.mrb[1].mxu1 }
 0x219   :  { %v298_v42 = vpop.f32.mrb[2].mxu1 }
 0x21a   :  { %320 = vst [vmem:[#allocation9] sm:$0xff] %v318_v40  ;;  %v319_v43 = vadd.f32 %v357_v38, %v298_v42  ;;  %v415_v44 = vpop.f32.mrb[3].mxu1 }
 0x21c   :  { %321 = vst [vmem:[#allocation9 + $0x8] sm:$0xff] %v319_v43 }
 0x21d   :  { %523 = shalt.err (!%p520_p0)
}
 0x21e   :  { %s524_s12 = scalar_lea.hbm %s651_s5, 256 }
 0x21f   :  { %p525_p1 = scmp.ne.s32.totalorder %s651_s5, %s524_s12  ;;  %p528_p2 = scmp.lt.u32.totalorder %s524_s12, %s651_s5 }
 0x221   :  { %p530_p3 = pnand %p528_p2, %p525_p1 }
 0x223   :  { %533 = shalt.err (!%p530_p3)
}
 0x224   :  { %333 = dma.vmem_to_hbm [thread:$0]  %s328_s9, 256, %s651_s5, [#allocation5], %s544_s1, %s544_s1, %s545_s17  }
 0x225   :  { %538 = dma.done.wait [#allocation5], 256  }
 0x226   :  { %539 = vsyncadd [#allocation5], 4294967040 }
 0x227   :  { %337 = vsyncpa [#allocation4], 1 }
 0x228   :  { %338 = vsyncpa [#allocation7], 1 }
 0x229   :  { %339 = vsyncpa [#allocation5], 1 }

// kernel: tpu_custom_call.1
= control target key start
LH: loop header
LB: loop body
LE: loop exit
PB: predicated region body
PF: predicated region fallthrough
CT: control target
= control target key end

     0   :  { %10 = vsyncpa [#allocation4], 0  ;;  %s646_s0 = inlined_call_operand.hbm [shape: f32[16,128], index: 0, kind: input, shape index: {}]   ;;  %s647_s1 = inlined_call_operand.hbm [shape: bf16[128,128], index: 1, kind: input, shape index: {}]   ;;  %s648_s2 = inlined_call_operand.vmem [shape: f32[1,128], index: 2, kind: input, shape index: {}]   ;;  %s649_s3 = inlined_call_operand.hbm [shape: bf16[128,128], index: 3, kind: input, shape index: {}]   ;;  %s650_s4 = inlined_call_operand.vmem [shape: f32[1,128], index: 4, kind: input, shape index: {}]   ;;  %s651_s5 = inlined_call_operand.hbm [shape: f32[16,128], index: 5, kind: output, shape index: {}]  }
   0x1   :  { %11 = vsyncpa [#allocation7], 0 }
   0x2   :  { %12 = vsyncpa [#allocation5], 0  ;;  %s540_s18 = smov [#allocation6]   ;;  %s446_s22 = scalar_lea.hbm %s647_s1, 1024 }
   0x3   :  { %s30_s19 = sshll.u32 %s540_s18, 4  ;;  %p447_p0 = scmp.ne.s32.totalorder %s647_s1, %s446_s22  ;;  %s31_s19 = int_to_ptr.vmem [resolvable:$true] %s30_s19 }
   0x4   :  { %p450_p1 = scmp.lt.u32.totalorder %s446_s22, %s647_s1 }
   0x6   :  { %p452_p2 = pnand %p450_p1, %p447_p0 }
   0x8   :  { %455 = shalt.err (!%p452_p2)
}
   0x9   :  { %s456_s27 = scalar_lea.vmem %s31_s19, 1024  ;;  %p461_p4 = scmp.lt.s32.totalorder %s31_s19, %s31_s19 }
   0xa   :  { %p457_p3 = scmp.ne.s32.totalorder %s31_s19, %s456_s27  ;;  %p462_p5 = scmp.lt.s32.totalorder %s456_s27, %s456_s27 }
   0xc   :  { %p463_p6 = por %p462_p5, %p461_p4 }
   0xe   :  { %p464_p7 = pnand %p463_p6, %p457_p3 }
  0x10   :  { %467 = shalt.err (!%p464_p7)
}
  0x11   :  { %s541_s28 = smov 64   ;;  %s542_s29 = smov 4  }
  0x12   :  { %36 = dma.hbm_to_vmem [thread:$0]  %s647_s1, 1024, %s31_s19, [#allocation7], %s541_s28, %s541_s28, %s542_s29  }
  0x13   :  { %s543_s7 = smov [#allocation3]   ;;  %s468_s11 = scalar_lea.hbm %s646_s0, 256 }
  0x14   :  { %s18_s8 = sshll.u32 %s543_s7, 4  ;;  %p469_p8 = scmp.ne.s32.totalorder %s646_s0, %s468_s11  ;;  %s19_s8 = int_to_ptr.vmem [resolvable:$true] %s18_s8 }
  0x15   :  { %p472_p9 = scmp.lt.u32.totalorder %s468_s11, %s646_s0 }
  0x17   :  { %p474_p10 = pnand %p472_p9, %p469_p8 }
  0x19   :  { %477 = shalt.err (!%p474_p10)
}
  0x1a   :  { %s478_s16 = scalar_lea.vmem %s19_s8, 256  ;;  %p483_p12 = scmp.lt.s32.totalorder %s19_s8, %s19_s8 }
  0x1b   :  { %p479_p11 = scmp.ne.s32.totalorder %s19_s8, %s478_s16  ;;  %p484_p13 = scmp.lt.s32.totalorder %s478_s16, %s478_s16 }
  0x1d   :  { %p485_p0 = por %p484_p13, %p483_p12 }
  0x1f   :  { %p486_p1 = pnand %p485_p0, %p479_p11 }
  0x21   :  { %489 = shalt.err (!%p486_p1)
}
  0x22   :  { %s544_s1 = smov 128   ;;  %s545_s17 = smov 8  }
  0x23   :  { %24 = dma.hbm_to_vmem [thread:$0]  %s646_s0, 256, %s19_s8, [#allocation4], %s544_s1, %s544_s1, %s545_s17  }
  0x24   :  { %s546_s20 = smov [#allocation8]   ;;  %s490_s24 = scalar_lea.hbm %s649_s3, 1024 }
  0x25   :  { %s44_s21 = sshll.u32 %s546_s20, 4  ;;  %p491_p2 = scmp.ne.s32.totalorder %s649_s3, %s490_s24  ;;  %s45_s21 = int_to_ptr.vmem [resolvable:$true] %s44_s21 }
  0x26   :  { %p494_p3 = scmp.lt.u32.totalorder %s490_s24, %s649_s3 }
  0x28   :  { %p496_p4 = pnand %p494_p3, %p491_p2 }
  0x2a   :  { %499 = shalt.err (!%p496_p4)
}
  0x2b   :  { %s500_s6 = scalar_lea.vmem %s45_s21, 1024  ;;  %p505_p6 = scmp.lt.s32.totalorder %s45_s21, %s45_s21 }
  0x2c   :  { %p501_p5 = scmp.ne.s32.totalorder %s45_s21, %s500_s6  ;;  %p506_p7 = scmp.lt.s32.totalorder %s500_s6, %s500_s6 }
  0x2e   :  { %p507_p8 = por %p506_p7, %p505_p6 }
  0x30   :  { %p508_p9 = pnand %p507_p8, %p501_p5 }
  0x32   :  { %511 = shalt.err (!%p508_p9)
}
  0x33   :  { %50 = dma.hbm_to_vmem [thread:$0]  %s649_s3, 1024, %s45_s21, [#allocation7], %s541_s28, %s541_s28, %s542_s29  }
  0x34   :  { %534 = dma.done.wait [#allocation4], 256  }
  0x35   :  { %535 = vsyncadd [#allocation4], 4294967040 }
  0x36   :  { %536 = dma.done.wait [#allocation7], 2048  }
  0x37   :  { %537 = vsyncadd [#allocation7], 4294965248  ;;  %v547_v0 = vmov 0.0   ;;  %vm548_vm0 = vmmov 0   ;;  %v426_v1 = vld [vmem:[#allocation6] sm:$0xff]   ;;  %v427_v2 = vld [vmem:[#allocation6 + $0x8] sm:$0xff]  }
  0x38   :  { %376 = vmatprep.subr.bf16.mxu0 %v547_v0  ;;  %392 = vmatprep.mubr.msk.bf16.mxu0 %vm548_vm0, %v547_v0  ;;  %v428_v3 = vld [vmem:[#allocation6 + $0x10] sm:$0xff]   ;;  %v434_v4 = vld [vmem:[#allocation8] sm:$0xff]   ;;  %v429_v5 = vld [vmem:[#allocation6 + $0x18] sm:$0xff]   ;;  %s549_s8 = smov [#allocation9]  }
  0x39   :  { %396 = vmatprep.subr.bf16.mxu1 %v547_v0  ;;  %412 = vmatprep.mubr.msk.bf16.mxu1 %vm548_vm0, %v547_v0  ;;  %v435_v6 = vld [vmem:[#allocation8 + $0x8] sm:$0xff]   ;;  %v430_v7 = vld [vmem:[#allocation6 + $0x20] sm:$0xff]   ;;  %v432_v9 = vld [vmem:[#allocation6 + $0x30] sm:$0xff]   ;;  %s327_s9 = sshll.u32 %s549_s8, 4  ;;  %s328_s9 = int_to_ptr.vmem [resolvable:$true] %s327_s9 }
  0x3a   :  { %377 = vmatpush3.bf16.msra.mxu0 %v426_v1  ;;  %397 = vmatpush3.bf16.msra.mxu1 %v434_v4  ;;  %v431_v8 = vld [vmem:[#allocation6 + $0x28] sm:$0xff]   ;;  %v433_v10 = vld [vmem:[#allocation6 + $0x38] sm:$0xff]   ;;  %v69_v11 = vld [vmem:[#allocation3] sm:$0xff]  ;;  %s512_s10 = scalar_lea.vmem %s328_s9, 256  ;;  %p517_p11 = scmp.lt.s32.totalorder %s328_s9, %s328_s9 }
  0x3b   :  { %378 = vmatprep.subr.bf16.mxu0 %v547_v0  ;;  %398 = vmatprep.subr.bf16.mxu1 %v547_v0  ;;  %v70_v12 = vld [vmem:[#allocation3 + $0x8] sm:$0xff]  ;;  %v436_v14 = vld [vmem:[#allocation8 + $0x10] sm:$0xff]   ;;  %v438_v16 = vld [vmem:[#allocation8 + $0x20] sm:$0xff]   ;;  %p513_p10 = scmp.ne.s32.totalorder %s328_s9, %s512_s10  ;;  %p518_p12 = scmp.lt.s32.totalorder %s512_s10, %s512_s10 }
  0x3c   :  { %v71_v13 = vpack.c.bf16 %v70_v12, %v69_v11  ;;  %v437_v15 = vld [vmem:[#allocation8 + $0x18] sm:$0xff]   ;;  %v439_v17 = vld [vmem:[#allocation8 + $0x28] sm:$0xff]   ;;  %v440_v18 = vld [vmem:[#allocation8 + $0x30] sm:$0xff]  }
  0x3d   :  { %v441_v19 = vld [vmem:[#allocation8 + $0x38] sm:$0xff]   ;;  %v340_v20 = vld [vmem:[%s648_s2] ss:$0 sm:$0xff]  ;;  %p519_p13 = por %p518_p12, %p517_p11 }
  0x3e   :  { %379 = vmatpush3.bf16.msra.mxu0 %v427_v2  ;;  %399 = vmatpush3.bf16.msra.mxu1 %v435_v6  ;;  %v357_v38 = vld [vmem:[%s650_s4] ss:$0 sm:$0xff] }
  0x3f   :  { %380 = vmatprep.subr.bf16.mxu0 %v547_v0  ;;  %400 = vmatprep.subr.bf16.mxu1 %v547_v0  ;;  %p520_p0 = pnand %p519_p13, %p513_p10 }
  0x42   :  { %381 = vmatpush3.bf16.msra.mxu0 %v428_v3  ;;  %401 = vmatpush3.bf16.msra.mxu1 %v436_v14 }
  0x43   :  { %382 = vmatprep.subr.bf16.mxu0 %v547_v0  ;;  %402 = vmatprep.subr.bf16.mxu1 %v547_v0 }
  0x46   :  { %383 = vmatpush3.bf16.msra.mxu0 %v429_v5  ;;  %403 = vmatpush3.bf16.msra.mxu1 %v437_v15 }
  0x47   :  { %384 = vmatprep.subr.bf16.mxu0 %v547_v0  ;;  %404 = vmatprep.subr.bf16.mxu1 %v547_v0 }
  0x4a   :  { %385 = vmatpush3.bf16.msra.mxu0 %v430_v7  ;;  %405 = vmatpush3.bf16.msra.mxu1 %v438_v16 }
  0x4b   :  { %386 = vmatprep.subr.bf16.mxu0 %v547_v0  ;;  %406 = vmatprep.subr.bf16.mxu1 %v547_v0 }
  0x4e   :  { %387 = vmatpush3.bf16.msra.mxu0 %v431_v8  ;;  %407 = vmatpush3.bf16.msra.mxu1 %v439_v17 }
  0x4f   :  { %388 = vmatprep.subr.bf16.mxu0 %v547_v0  ;;  %408 = vmatprep.subr.bf16.mxu1 %v547_v0 }
  0x52   :  { %389 = vmatpush3.bf16.msra.mxu0 %v432_v9  ;;  %409 = vmatpush3.bf16.msra.mxu1 %v440_v18 }
  0x53   :  { %390 = vmatprep.subr.bf16.mxu0 %v547_v0  ;;  %410 = vmatprep.subr.bf16.mxu1 %v547_v0 }
  0x56   :  { %391 = vmatpush3.bf16.msra.mxu0 %v433_v10  ;;  %411 = vmatpush3.bf16.msra.mxu1 %v441_v19 }
  0x59   :  { %393 = vmatmul.mubr.bf16.vlgmr.msra.gmra.mrb[0].mxu0 %v71_v13 }
 0x12c   :  { %v177_v21 = vpop.f32.mrb[0].mxu0 }
 0x12d   :  { %v178_v22 = vadd.f32 %v340_v20, %v177_v21  ;;  %v394_v23 = vpop.f32.mrb[1].mxu0 }
 0x12e   :  { %v180_v24 = vpop.f32.mrb[2].mxu0 }
 0x12f   :  { %v186_v25 = vmul.f32 0.70710677, %v178_v22  ;;  %v181_v26 = vadd.f32 %v340_v20, %v180_v24  ;;  %v395_v27 = vpop.f32.mrb[3].mxu0  ;;  %v184_v32 = vmul.f32 0.5, %v178_v22 }
 0x131   :  { %442 = verf.f32 %v186_v25  ;;  %v187_v28 = vmul.f32 0.70710677, %v181_v26  ;;  %v185_v33 = vmul.f32 0.5, %v181_v26 }
 0x133   :  { %444 = verf.f32 %v187_v28 }
 0x13b   :  { %v443_v29 = vpop.eup %442 }
 0x13c   :  { %v190_v30 = vadd.f32 1.0, %v443_v29 }
 0x13d   :  { %v445_v31 = vpop.eup %444 }
 0x13e   :  { %v191_v34 = vadd.f32 1.0, %v445_v31  ;;  %v192_v35 = vmul.f32 %v190_v30, %v184_v32 }
 0x140   :  { %v193_v36 = vmul.f32 %v191_v34, %v185_v33 }
 0x142   :  { %v194_v37 = vpack.c.bf16 %v193_v36, %v192_v35 }
 0x144   :  { %413 = vmatmul.mubr.bf16.vlgmr.msra.gmra.mrb[0].mxu1 %v194_v37 }
 0x217   :  { %v295_v39 = vpop.f32.mrb[0].mxu1 }
 0x218   :  { %v318_v40 = vadd.f32 %v357_v38, %v295_v39  ;;  %v414_v41 = vpop.f32.mrb[1].mxu1 }
 0x219   :  { %v298_v42 = vpop.f32.mrb[2].mxu1 }
 0x21a   :  { %320 = vst [vmem:[#allocation9] sm:$0xff] %v318_v40  ;;  %v319_v43 = vadd.f32 %v357_v38, %v298_v42  ;;  %v415_v44 = vpop.f32.mrb[3].mxu1 }
 0x21c   :  { %321 = vst [vmem:[#allocation9 + $0x8] sm:$0xff] %v319_v43 }
 0x21d   :  { %523 = shalt.err (!%p520_p0)
}
 0x21e   :  { %s524_s12 = scalar_lea.hbm %s651_s5, 256 }
 0x21f   :  { %p525_p1 = scmp.ne.s32.totalorder %s651_s5, %s524_s12  ;;  %p528_p2 = scmp.lt.u32.totalorder %s524_s12, %s651_s5 }
 0x221   :  { %p530_p3 = pnand %p528_p2, %p525_p1 }
 0x223   :  { %533 = shalt.err (!%p530_p3)
}
 0x224   :  { %333 = dma.vmem_to_hbm [thread:$0]  %s328_s9, 256, %s651_s5, [#allocation5], %s544_s1, %s544_s1, %s545_s17  }
 0x225   :  { %538 = dma.done.wait [#allocation5], 256  }
 0x226   :  { %539 = vsyncadd [#allocation5], 4294967040 }
 0x227   :  { %337 = vsyncpa [#allocation4], 1 }
 0x228   :  { %338 = vsyncpa [#allocation7], 1 }
 0x229   :  { %339 = vsyncpa [#allocation5], 1 }

</bundles_post_ra>
